<compile_context>
chip_gen: v5e
topology: v5e:2x2
jax: 0.10.0
libtpu: 0.0.40
codegen_flags: <defaults>
</compile_context>

<pallas_src>
import jax
import jax.numpy as jnp
from jax.experimental import pallas as pl
from jax.experimental.pallas import tpu as pltpu


def _round_up(x, m):
    return ((x + m - 1) // m) * m


def _object_model_kernel(x_ref, w1_ref, b1_ref, w2_ref, b2_ref, o_ref):
    # x:(T, P*K)  w1:(P*K, P*H)  b1:(1, P*H) f32  w2:(P*H, P*O)  b2:(1, P*O) f32
    x = x_ref[...]
    # Native-dtype operands, f32 accumulation on the MXU.
    h = jnp.dot(x, w1_ref[...], preferred_element_type=jnp.float32)
    h = h + b1_ref[...]                       # b1 already has BN folded in (f32)
    h = jnp.maximum(h, 0.0)
    h = h.astype(x.dtype)                     # keep second matmul on the bf16/native path
    out = jnp.dot(h, w2_ref[...], preferred_element_type=jnp.float32)
    out = out + b2_ref[...]
    o_ref[...] = out.astype(o_ref.dtype)


def _pick_pack_factor(out_features, in_features, hidden, dtype_bytes,
                      max_weight_bytes=4 << 20):
    """How many rows to pack into the lane axis.

    Packing to P=8 makes a (.., 16)-wide output lane-dense (128 lanes) so the
    writeback uses unmasked stores; the cost is block-diagonal weights of size
    (P*K, P*H) / (P*H, P*O), which we keep under a small budget (the extra zero
    MACs are free: the kernel is memory-bound).
    """
    if out_features >= 128:
        return 1
    for p in (8, 4, 2):
        w1_bytes = (p * in_features) * (p * hidden) * dtype_bytes
        w2_bytes = (p * hidden) * (p * out_features) * dtype_bytes
        if max(w1_bytes, w2_bytes) <= max_weight_bytes:
            return p
    return 1


def _pick_tile_rows(rows, packed_in, packed_out, dtype_bytes,
                    budget_bytes=16 << 20, max_tile=2048, min_tile=256,
                    target_steps=8):
    """Packed-row tile size.

    Budgets the *lane-padded* ((8,128)-rounded) double-buffered streaming
    footprint (x tile + out tile), then caps the tile so there are at least
    `target_steps` grid steps when there is enough work (keeps DMA pipelined
    and gives each v7x TensorCore >= 4 steps).  With the packed layout the
    footprint at the 2048-row clamp is ~6 MiB, inside every generation's
    default scoped VMEM (16 MiB v5e, 32 MiB v6e/v7x).
    """
    per_row = 2 * (_round_up(packed_in, 128) + _round_up(packed_out, 128)) * dtype_bytes
    tile = budget_bytes // max(per_row, 1)
    tile = min(int(tile), max_tile)
    if rows <= tile:
        return rows                     # single full-extent block (always legal)
    if rows >= min_tile * target_steps:
        per_step = _round_up(pl.cdiv(rows, target_steps), 8)
        tile = min(tile, max(per_step, min_tile))
    tile = max(8, tile - tile % 8)      # tiled blocks must be sublane-aligned
    return tile


def object_model_forward(x, w1, b1, bn_weight, bn_bias, w2, b2,
                         *, pack=None, tile_rows=None, vmem_limit_bytes=None):
    """Fused ObjectModel forward: relu((x @ w1 + b1) * bn_w + bn_b) @ w2 + b2.

    x:  (N, input_size) node features
    w1: (input_size, hidden_size),  b1/bn_weight/bn_bias: (hidden_size,)
    w2: (hidden_size, output_size), b2: (output_size,)
    Returns (N, output_size) in x.dtype.
    """
    n, k = x.shape
    k_w1, h = w1.shape
    h_w2, o = w2.shape
    assert k == k_w1 and h == h_w2, "weight shapes inconsistent with x"

    dtype = x.dtype
    dt_bytes = jnp.dtype(dtype).itemsize

    # --- Fold BatchNorm (scale/bias) into the first linear (host-side, once).
    bn_w32 = bn_weight.astype(jnp.float32)
    w1_eff = (w1.astype(jnp.float32) * bn_w32[None, :]).astype(w1.dtype)
    b1_eff = b1.astype(jnp.float32) * bn_w32 + bn_bias.astype(jnp.float32)
    b2_f32 = b2.astype(jnp.float32)

    # --- Lane packing: P rows per packed row, block-diagonal weights.
    p = pack if pack is not None else _pick_pack_factor(o, k, h, dt_bytes)
    if p > 1:
        eye_p = jnp.eye(p, dtype=jnp.float32)
        w1_p = jnp.einsum("pq,kh->pkqh", eye_p, w1_eff.astype(jnp.float32))
        w1_p = w1_p.reshape(p * k, p * h).astype(w1.dtype)
        w2_p = jnp.einsum("pq,ho->phqo", eye_p, w2.astype(jnp.float32))
        w2_p = w2_p.reshape(p * h, p * o).astype(w2.dtype)
        b1_p = jnp.tile(b1_eff, p).reshape(1, p * h)
        b2_p = jnp.tile(b2_f32, p).reshape(1, p * o)
    else:
        w1_p, w2_p = w1_eff, w2
        b1_p = b1_eff.reshape(1, h)
        b2_p = b2_f32.reshape(1, o)

    # Row count must be a multiple of P for the packing reshape.  Common case
    # (and the demo) is n % P == 0: no copy at all.
    n_pad = _round_up(n, p)
    if n_pad != n:
        # TODO(synk): this pad is a full HBM copy of x; only taken when N % P != 0.
        x_in = jnp.pad(x, ((0, n_pad - n), (0, 0)))
    else:
        x_in = x
    rows = n_pad // p
    kp, hp, op_ = p * k, p * h, p * o
    x_in = x_in.reshape(rows, kp)          # contiguous-row no-op

    tile = tile_rows if tile_rows is not None else _pick_tile_rows(rows, kp, op_, dt_bytes)
    grid = (pl.cdiv(rows, tile),)          # ragged last block handled by Pallas

    out = pl.pallas_call(
        _object_model_kernel,
        out_shape=jax.ShapeDtypeStruct((rows, op_), dtype),
        grid_spec=pltpu.PrefetchScalarGridSpec(
            num_scalar_prefetch=0,
            grid=grid,
            in_specs=[
                pl.BlockSpec((tile, kp), lambda i: (i, 0)),   # x tile (streamed, lane-dense)
                pl.BlockSpec((kp, hp), lambda i: (0, 0)),     # W1' (resident)
                pl.BlockSpec((1, hp), lambda i: (0, 0)),      # b1' with BN folded (f32)
                pl.BlockSpec((hp, op_), lambda i: (0, 0)),    # W2' (resident)
                pl.BlockSpec((1, op_), lambda i: (0, 0)),     # b2' (f32)
            ],
            out_specs=pl.BlockSpec((tile, op_), lambda i: (i, 0)),  # lane-dense output
        ),
        compiler_params=pltpu.CompilerParams(
            dimension_semantics=("parallel",),
            vmem_limit_bytes=vmem_limit_bytes,   # defaults fit: <=~7 MiB footprint
        ),
    )(x_in, w1_p, b1_p, w2_p, b2_p)

    out = out.reshape(n_pad, o)            # contiguous-row no-op
    return out if n_pad == n else out[:n]


if __name__ == "__main__":
    key = jax.random.PRNGKey(0)
    ks = jax.random.split(key, 7)

    # Small, deterministic example: 200 nodes (multiple of the pack factor 8,
    # so no padding copies), input_size=32, hidden_size=32, output_size=16.
    N, IN, HID, OUT = 200, 32, 32, 16

    x = jax.random.normal(ks[0], (N, IN), dtype=jnp.float32)
    w1 = jax.random.normal(ks[1], (IN, HID), dtype=jnp.float32) / jnp.sqrt(IN)
    b1 = 0.1 * jax.random.normal(ks[2], (HID,), dtype=jnp.float32)
    bn_w = 1.0 + 0.1 * jax.random.normal(ks[3], (HID,), dtype=jnp.float32)
    bn_b = 0.1 * jax.random.normal(ks[4], (HID,), dtype=jnp.float32)
    w2 = jax.random.normal(ks[5], (HID, OUT), dtype=jnp.float32) / jnp.sqrt(HID)
    b2 = 0.1 * jax.random.normal(ks[6], (OUT,), dtype=jnp.float32)

    out = object_model_forward(x, w1, b1, bn_w, bn_b, w2, b2)
    out = jax.block_until_ready(out)

    # Pure-JAX reference of the float semantics.
    h_ref = x @ w1 + b1[None, :]
    h_ref = h_ref * bn_w[None, :] + bn_b[None, :]
    h_ref = jnp.maximum(h_ref, 0.0)
    ref = h_ref @ w2 + b2[None, :]

    assert out.shape == (N, OUT) and out.dtype == x.dtype
    max_err = float(jnp.max(jnp.abs(out - ref)))
    assert jnp.allclose(out, ref, atol=2e-2, rtol=2e-2), f"max abs err {max_err}"

    print("KERNEL_OK")
</pallas_src>

<mosaic_0001>
module attributes {stable_mosaic.version = 11 : i64} {
  func.func @_object_model_kernel(%arg0: i32, %arg1: memref<25x256xf32, #tpu.memory_space<vmem>>, %arg2: memref<256x256xf32, #tpu.memory_space<vmem>>, %arg3: memref<1x256xf32, #tpu.memory_space<vmem>>, %arg4: memref<256x128xf32, #tpu.memory_space<vmem>>, %arg5: memref<1x128xf32, #tpu.memory_space<vmem>>, %arg6: memref<25x128xf32, #tpu.memory_space<vmem>>) attributes {dimension_semantics = [#tpu.dimension_semantics<parallel>], iteration_bounds = array<i64: 1>, scalar_prefetch = 0 : i64, scratch_operands = 0 : i64, tpu.core_type = #tpu.core_type<tc>, window_params = [{transform_indices = @transform_0, window_bounds = array<i64: 25, 256>}, {pipeline_mode = #tpu.pipeline_mode<synchronous>, transform_indices = @transform_1, window_bounds = array<i64: 256, 256>}, {pipeline_mode = #tpu.pipeline_mode<synchronous>, transform_indices = @transform_2, window_bounds = array<i64: 1, 256>}, {pipeline_mode = #tpu.pipeline_mode<synchronous>, transform_indices = @transform_3, window_bounds = array<i64: 256, 128>}, {pipeline_mode = #tpu.pipeline_mode<synchronous>, transform_indices = @transform_4, window_bounds = array<i64: 1, 128>}, {transform_indices = @transform_5, window_bounds = array<i64: 25, 128>}]} {
    %c0 = arith.constant 0 : index
    %c0_0 = arith.constant 0 : index
    %0 = vector.load %arg1[%c0, %c0_0] : memref<25x256xf32, #tpu.memory_space<vmem>>, vector<25x256xf32>
    %c0_1 = arith.constant 0 : index
    %c0_2 = arith.constant 0 : index
    %1 = vector.load %arg2[%c0_1, %c0_2] : memref<256x256xf32, #tpu.memory_space<vmem>>, vector<256x256xf32>
    %cst = arith.constant dense<0.000000e+00> : vector<25x256xf32>
    %2 = tpu.matmul %0, %1, %cst {dimension_numbers = #tpu.dot_dimension_numbers<[1], [0], [0], [1], [0, 0, 1, 1], [], []>} : vector<25x256xf32>, vector<256x256xf32>, vector<25x256xf32> -> vector<25x256xf32>
    %c0_3 = arith.constant 0 : index
    %c0_4 = arith.constant 0 : index
    %3 = vector.load %arg3[%c0_3, %c0_4] : memref<1x256xf32, #tpu.memory_space<vmem>>, vector<1x256xf32>
    %4 = vector.broadcast %3 : vector<1x256xf32> to vector<25x256xf32>
    %5 = arith.addf %2, %4 : vector<25x256xf32>
    %cst_5 = arith.constant 0.000000e+00 : f32
    %6 = vector.broadcast %cst_5 : f32 to vector<25x256xf32>
    %7 = arith.maximumf %5, %6 : vector<25x256xf32>
    %c0_6 = arith.constant 0 : index
    %c0_7 = arith.constant 0 : index
    %8 = vector.load %arg4[%c0_6, %c0_7] : memref<256x128xf32, #tpu.memory_space<vmem>>, vector<256x128xf32>
    %cst_8 = arith.constant dense<0.000000e+00> : vector<25x128xf32>
    %9 = tpu.matmul %7, %8, %cst_8 {dimension_numbers = #tpu.dot_dimension_numbers<[1], [0], [0], [1], [0, 0, 1, 1], [], []>} : vector<25x256xf32>, vector<256x128xf32>, vector<25x128xf32> -> vector<25x128xf32>
    %c0_9 = arith.constant 0 : index
    %c0_10 = arith.constant 0 : index
    %10 = vector.load %arg5[%c0_9, %c0_10] : memref<1x128xf32, #tpu.memory_space<vmem>>, vector<1x128xf32>
    %11 = vector.broadcast %10 : vector<1x128xf32> to vector<25x128xf32>
    %12 = arith.addf %9, %11 : vector<25x128xf32>
    %c0_11 = arith.constant 0 : index
    %c0_12 = arith.constant 0 : index
    %13 = vector.load %arg6[%c0_11, %c0_12] : memref<25x128xf32, #tpu.memory_space<vmem>>, vector<25x128xf32>
    tpu.vector_store %arg6[%c0_11, %c0_12], %12 {strides = array<i32>} : memref<25x128xf32, #tpu.memory_space<vmem>>, vector<25x128xf32>,
    return
  }
  func.func @transform_0(%arg0: i32) -> (i32, i32) {
    %c0_i32 = arith.constant 0 : i32
    %c0_i32_0 = arith.constant 0 : i32
    return %arg0, %c0_i32 : i32, i32
  }
  func.func @transform_1(%arg0: i32) -> (i32, i32) {
    %c0_i32 = arith.constant 0 : i32
    %c0_i32_0 = arith.constant 0 : i32
    %c0_i32_1 = arith.constant 0 : i32
    return %c0_i32, %c0_i32_0 : i32, i32
  }
  func.func @transform_2(%arg0: i32) -> (i32, i32) {
    %c0_i32 = arith.constant 0 : i32
    %c0_i32_0 = arith.constant 0 : i32
    %c0_i32_1 = arith.constant 0 : i32
    return %c0_i32, %c0_i32_0 : i32, i32
  }
  func.func @transform_3(%arg0: i32) -> (i32, i32) {
    %c0_i32 = arith.constant 0 : i32
    %c0_i32_0 = arith.constant 0 : i32
    %c0_i32_1 = arith.constant 0 : i32
    return %c0_i32, %c0_i32_0 : i32, i32
  }
  func.func @transform_4(%arg0: i32) -> (i32, i32) {
    %c0_i32 = arith.constant 0 : i32
    %c0_i32_0 = arith.constant 0 : i32
    %c0_i32_1 = arith.constant 0 : i32
    return %c0_i32, %c0_i32_0 : i32, i32
  }
  func.func @transform_5(%arg0: i32) -> (i32, i32) {
    %c0_i32 = arith.constant 0 : i32
    %c0_i32_0 = arith.constant 0 : i32
    return %arg0, %c0_i32 : i32, i32
  }
}

</mosaic_0001>

<bundles_post_ra>
// kernel: tpu_custom_call.1
= control target key start
LH: loop header
LB: loop body
LE: loop exit
PB: predicated region body
PF: predicated region fallthrough
CT: control target
= control target key end

     0   :  { %10 = vsyncpa [#allocation3], 0  ;;  %s636_s0 = inlined_call_operand.hbm [shape: f32[25,256], index: 0, kind: input, shape index: {}]   ;;  %s637_s1 = inlined_call_operand.hbm [shape: f32[256,256], index: 1, kind: input, shape index: {}]   ;;  %s638_s2 = inlined_call_operand.hbm [shape: f32[1,256], index: 2, kind: input, shape index: {}]   ;;  %s639_s3 = inlined_call_operand.hbm [shape: f32[256,128], index: 3, kind: input, shape index: {}]   ;;  %s640_s4 = inlined_call_operand.vmem [shape: f32[1,128], index: 4, kind: input, shape index: {}]   ;;  %s641_s5 = inlined_call_operand.hbm [shape: f32[25,128], index: 5, kind: output, shape index: {}]  }
   0x1   :  { %11 = vsyncpa [#allocation6], 0 }
   0x2   :  { %12 = vsyncpa [#allocation9], 0 }
   0x3   :  { %13 = vsyncpa [#allocation4], 0  ;;  %s31_s20 = sshll.u32 %s637_s1, 4  ;;  %s573_s21 = smov [#allocation5]   ;;  %s32_s20 = int_to_ptr.hbm [resolvable:$true] %s31_s20 }
   0x4   :  { %s33_s22 = sshll.u32 %s573_s21, 4  ;;  %s18_s25 = sshll.u32 %s636_s0, 4  ;;  %s34_s22 = int_to_ptr.vmem [resolvable:$true] %s33_s22  ;;  %s19_s25 = int_to_ptr.hbm [resolvable:$true] %s18_s25 }
   0x5   :  { %s574_s26 = smov 256   ;;  %s575_s27 = smov 16  }
   0x6   :  { %39 = dma.hbm_to_vmem [thread:$0]  %s32_s20, 8192, %s34_s22, [#allocation6], %s574_s26, %s574_s26, %s575_s27  }
   0x7   :  { %s576_s28 = smov [#allocation2]   ;;  %s45_s7 = sshll.u32 %s638_s2, 4  ;;  %s46_s7 = int_to_ptr.hbm [resolvable:$true] %s45_s7 }
   0x8   :  { %s20_s29 = sshll.u32 %s576_s28, 4  ;;  %s55_s9 = sshll.u32 %s639_s3, 4  ;;  %s21_s29 = int_to_ptr.vmem [resolvable:$true] %s20_s29  ;;  %s56_s9 = int_to_ptr.hbm [resolvable:$true] %s55_s9 }
   0x9   :  { %26 = dma.hbm_to_vmem [thread:$0]  %s19_s25, 1024, %s21_s29, [#allocation3], %s574_s26, %s574_s26, %s575_s27  }
   0xa   :  { %s577_s10 = smov [#allocation7]   ;;  %s578_s0 = smov [#allocation8]  }
   0xb   :  { %s47_s11 = sshll.u32 %s577_s10, 4  ;;  %s57_s12 = sshll.u32 %s578_s0, 4  ;;  %s48_s11 = int_to_ptr.vmem [resolvable:$true] %s47_s11  ;;  %s58_s12 = int_to_ptr.vmem [resolvable:$true] %s57_s12 }
   0xc   :  { %50 = dma.hbm_to_vmem [thread:$0]  %s46_s7, 32, %s48_s11, [#allocation6]  }
   0xd   :  { %s579_s13 = smov 128   ;;  %s580_s14 = smov 8  }
   0xe   :  { %63 = dma.hbm_to_vmem [thread:$0]  %s56_s9, 4096, %s58_s12, [#allocation9], %s579_s13, %s579_s13, %s580_s14  }
   0xf   :  { %565 = dma.done.wait [#allocation3], 1024  }
  0x10   :  { %566 = vsyncadd [#allocation3], 4294966272 }
  0x11   :  { %567 = dma.done.wait [#allocation6], 8224  }
  0x12   :  { %568 = vsyncadd [#allocation6], 4294959072 }
  0x13   :  { %569 = dma.done.wait [#allocation9], 4096  }
  0x14   :  { %570 = vsyncadd [#allocation9], 4294963200  ;;  %v121_v0 = vld [vmem:[#allocation5 + $0xf8] sm:$0xff]  ;;  %v119_v1 = vld [vmem:[#allocation5 + $0xe8] sm:$0xff]  ;;  %s581_s15 = smov [#allocation10]   ;;  %s388_s18 = sshll.u32 %s641_s5, 4  ;;  %s389_s18 = int_to_ptr.hbm [resolvable:$true] %s388_s18 }
  0x15   :  { %v153_v2 = vld [vmem:[#allocation5 + $0x1f8] sm:$0xff]  ;;  %218 = vmatpush.msra.mxu2 %v121_v0  ;;  %v120_v3 = vld [vmem:[#allocation5 + $0xf0] sm:$0xff]  ;;  %v151_v4 = vld [vmem:[#allocation5 + $0x1e8] sm:$0xff]  ;;  %s386_s16 = sshll.u32 %s581_s15, 4  ;;  %s387_s16 = int_to_ptr.vmem [resolvable:$true] %s386_s16 }
  0x16   :  { %247 = vmatpush.msra.mxu3 %v153_v2  ;;  %160 = vmatpush.msra.mxu0 %v120_v3  ;;  %v117_v5 = vld [vmem:[#allocation5 + $0xd8] sm:$0xff]  ;;  %v118_v6 = vld [vmem:[#allocation5 + $0xe0] sm:$0xff]  ;;  %v152_v7 = vld [vmem:[#allocation5 + $0x1f0] sm:$0xff] }
  0x17   :  { %219 = vmatpush.msra.mxu2 %v119_v1  ;;  %v149_v8 = vld [vmem:[#allocation5 + $0x1d8] sm:$0xff]  ;;  %v116_v9 = vld [vmem:[#allocation5 + $0xd0] sm:$0xff]  ;;  %v150_v10 = vld [vmem:[#allocation5 + $0x1e0] sm:$0xff]  ;;  %189 = vmatpush.msra.mxu1 %v152_v7 }
  0x18   :  { %248 = vmatpush.msra.mxu3 %v151_v4  ;;  %161 = vmatpush.msra.mxu0 %v118_v6  ;;  %v115_v11 = vld [vmem:[#allocation5 + $0xc8] sm:$0xff]  ;;  %v114_v13 = vld [vmem:[#allocation5 + $0xc0] sm:$0xff]  ;;  %v148_v14 = vld [vmem:[#allocation5 + $0x1d0] sm:$0xff] }
  0x19   :  { %v147_v12 = vld [vmem:[#allocation5 + $0x1c8] sm:$0xff]  ;;  %220 = vmatpush.msra.mxu2 %v117_v5  ;;  %190 = vmatpush.msra.mxu1 %v150_v10  ;;  %v113_v15 = vld [vmem:[#allocation5 + $0xb8] sm:$0xff]  ;;  %v112_v17 = vld [vmem:[#allocation5 + $0xb0] sm:$0xff] }
  0x1a   :  { %249 = vmatpush.msra.mxu3 %v149_v8  ;;  %162 = vmatpush.msra.mxu0 %v116_v9  ;;  %v145_v16 = vld [vmem:[#allocation5 + $0x1b8] sm:$0xff]  ;;  %v146_v18 = vld [vmem:[#allocation5 + $0x1c0] sm:$0xff]  ;;  %v111_v19 = vld [vmem:[#allocation5 + $0xa8] sm:$0xff] }
  0x1b   :  { %221 = vmatpush.msra.mxu2 %v115_v11  ;;  %191 = vmatpush.msra.mxu1 %v148_v14  ;;  %v143_v20 = vld [vmem:[#allocation5 + $0x1a8] sm:$0xff]  ;;  %v110_v21 = vld [vmem:[#allocation5 + $0xa0] sm:$0xff]  ;;  %v144_v22 = vld [vmem:[#allocation5 + $0x1b0] sm:$0xff] }
  0x1c   :  { %250 = vmatpush.msra.mxu3 %v147_v12  ;;  %163 = vmatpush.msra.mxu0 %v114_v13  ;;  %v109_v23 = vld [vmem:[#allocation5 + $0x98] sm:$0xff]  ;;  %v108_v25 = vld [vmem:[#allocation5 + $0x90] sm:$0xff]  ;;  %v142_v26 = vld [vmem:[#allocation5 + $0x1a0] sm:$0xff] }
  0x1d   :  { %222 = vmatpush.msra.mxu2 %v113_v15  ;;  %192 = vmatpush.msra.mxu1 %v146_v18  ;;  %v141_v24 = vld [vmem:[#allocation5 + $0x198] sm:$0xff]  ;;  %v107_v27 = vld [vmem:[#allocation5 + $0x88] sm:$0xff]  ;;  %v106_v29 = vld [vmem:[#allocation5 + $0x80] sm:$0xff] }
  0x1e   :  { %251 = vmatpush.msra.mxu3 %v145_v16  ;;  %164 = vmatpush.msra.mxu0 %v112_v17  ;;  %v139_v28 = vld [vmem:[#allocation5 + $0x188] sm:$0xff]  ;;  %v140_v30 = vld [vmem:[#allocation5 + $0x190] sm:$0xff]  ;;  %v105_v31 = vld [vmem:[#allocation5 + $0x78] sm:$0xff] }
  0x1f   :  { %223 = vmatpush.msra.mxu2 %v111_v19  ;;  %193 = vmatpush.msra.mxu1 %v144_v22  ;;  %v137_v32 = vld [vmem:[#allocation5 + $0x178] sm:$0xff]  ;;  %v104_v33 = vld [vmem:[#allocation5 + $0x70] sm:$0xff]  ;;  %v138_v34 = vld [vmem:[#allocation5 + $0x180] sm:$0xff] }
  0x20   :  { %252 = vmatpush.msra.mxu3 %v143_v20  ;;  %165 = vmatpush.msra.mxu0 %v110_v21  ;;  %v103_v35 = vld [vmem:[#allocation5 + $0x68] sm:$0xff]  ;;  %v102_v37 = vld [vmem:[#allocation5 + $0x60] sm:$0xff]  ;;  %v136_v38 = vld [vmem:[#allocation5 + $0x170] sm:$0xff] }
  0x21   :  { %224 = vmatpush.msra.mxu2 %v109_v23  ;;  %194 = vmatpush.msra.mxu1 %v142_v26  ;;  %v135_v36 = vld [vmem:[#allocation5 + $0x168] sm:$0xff]  ;;  %v101_v39 = vld [vmem:[#allocation5 + $0x58] sm:$0xff]  ;;  %v100_v41 = vld [vmem:[#allocation5 + $0x50] sm:$0xff] }
  0x22   :  { %253 = vmatpush.msra.mxu3 %v141_v24  ;;  %166 = vmatpush.msra.mxu0 %v108_v25  ;;  %v133_v40 = vld [vmem:[#allocation5 + $0x158] sm:$0xff]  ;;  %v134_v42 = vld [vmem:[#allocation5 + $0x160] sm:$0xff]  ;;  %v99_v43 = vld [vmem:[#allocation5 + $0x48] sm:$0xff] }
  0x23   :  { %225 = vmatpush.msra.mxu2 %v107_v27  ;;  %195 = vmatpush.msra.mxu1 %v140_v30  ;;  %v131_v44 = vld [vmem:[#allocation5 + $0x148] sm:$0xff]  ;;  %v98_v45 = vld [vmem:[#allocation5 + $0x40] sm:$0xff]  ;;  %v132_v46 = vld [vmem:[#allocation5 + $0x150] sm:$0xff] }
  0x24   :  { %254 = vmatpush.msra.mxu3 %v139_v28  ;;  %167 = vmatpush.msra.mxu0 %v106_v29  ;;  %v97_v47 = vld [vmem:[#allocation5 + $0x38] sm:$0xff]  ;;  %v96_v49 = vld [vmem:[#allocation5 + $0x30] sm:$0xff]  ;;  %v130_v50 = vld [vmem:[#allocation5 + $0x140] sm:$0xff] }
  0x25   :  { %226 = vmatpush.msra.mxu2 %v105_v31  ;;  %196 = vmatpush.msra.mxu1 %v138_v34  ;;  %v129_v48 = vld [vmem:[#allocation5 + $0x138] sm:$0xff]  ;;  %v95_v51 = vld [vmem:[#allocation5 + $0x28] sm:$0xff]  ;;  %v94_v53 = vld [vmem:[#allocation5 + $0x20] sm:$0xff] }
  0x26   :  { %255 = vmatpush.msra.mxu3 %v137_v32  ;;  %168 = vmatpush.msra.mxu0 %v104_v33  ;;  %v127_v52 = vld [vmem:[#allocation5 + $0x128] sm:$0xff]  ;;  %v128_v54 = vld [vmem:[#allocation5 + $0x130] sm:$0xff]  ;;  %v93_v55 = vld [vmem:[#allocation5 + $0x18] sm:$0xff] }
  0x27   :  { %227 = vmatpush.msra.mxu2 %v103_v35  ;;  %197 = vmatpush.msra.mxu1 %v136_v38  ;;  %v125_v56 = vld [vmem:[#allocation5 + $0x118] sm:$0xff]  ;;  %v92_v57 = vld [vmem:[#allocation5 + $0x10] sm:$0xff]  ;;  %v126_v58 = vld [vmem:[#allocation5 + $0x120] sm:$0xff] }
  0x28   :  { %256 = vmatpush.msra.mxu3 %v135_v36  ;;  %169 = vmatpush.msra.mxu0 %v102_v37  ;;  %v91_v59 = vld [vmem:[#allocation5 + $0x8] sm:$0xff]  ;;  %v82_v61 = vld [vmem:[#allocation2] sm:$0xff]  ;;  %v124_v0 = vld [vmem:[#allocation5 + $0x110] sm:$0xff] }
  0x29   :  { %228 = vmatpush.msra.mxu2 %v101_v39  ;;  %198 = vmatpush.msra.mxu1 %v134_v42  ;;  %v123_v60 = vld [vmem:[#allocation5 + $0x108] sm:$0xff]  ;;  %v90_v63 = vld [vmem:[#allocation5] sm:$0xff]  ;;  %v298_v3 = vld [vmem:[#allocation8 + $0x70] sm:$0xff] }
  0x2a   :  { %257 = vmatpush.msra.mxu3 %v133_v40  ;;  %170 = vmatpush.msra.mxu0 %v100_v41  ;;  %v83_v62 = vld [vmem:[#allocation2 + $0x8] sm:$0xff]  ;;  %v122_v1 = vld [vmem:[#allocation5 + $0x100] sm:$0xff]  ;;  %v314_v6 = vld [vmem:[#allocation8 + $0xf0] sm:$0xff] }
  0x2b   :  { %229 = vmatpush.msra.mxu2 %v99_v43  ;;  %199 = vmatpush.msra.mxu1 %v132_v46  ;;  %v299_v2 = vld [vmem:[#allocation8 + $0x78] sm:$0xff]  ;;  %v297_v5 = vld [vmem:[#allocation8 + $0x68] sm:$0xff]  ;;  %v296_v9 = vld [vmem:[#allocation8 + $0x60] sm:$0xff] }
  0x2c   :  { %258 = vmatpush.msra.mxu3 %v131_v44  ;;  %171 = vmatpush.msra.mxu0 %v98_v45  ;;  %v315_v4 = vld [vmem:[#allocation8 + $0xf8] sm:$0xff]  ;;  %v84_v7 = vld [vmem:[#allocation2 + $0x10] sm:$0xff]  ;;  %v312_v12 = vld [vmem:[#allocation8 + $0xe0] sm:$0xff] }
  0x2d   :  { %230 = vmatpush.msra.mxu2 %v97_v47  ;;  %200 = vmatpush.msra.mxu1 %v130_v50  ;;  %v85_v8 = vld [vmem:[#allocation2 + $0x18] sm:$0xff]  ;;  %v313_v10 = vld [vmem:[#allocation8 + $0xe8] sm:$0xff]  ;;  %v86_v17 = vld [vmem:[#allocation2 + $0x20] sm:$0xff] }
  0x2e   :  { %259 = vmatpush.msra.mxu3 %v129_v48  ;;  %172 = vmatpush.msra.mxu0 %v96_v49  ;;  %v295_v11 = vld [vmem:[#allocation8 + $0x58] sm:$0xff]  ;;  %v294_v13 = vld [vmem:[#allocation8 + $0x50] sm:$0xff]  ;;  %v293_v15 = vld [vmem:[#allocation8 + $0x48] sm:$0xff] }
  0x2f   :  { %231 = vmatpush.msra.mxu2 %v95_v51  ;;  %201 = vmatpush.msra.mxu1 %v128_v54  ;;  %v311_v14 = vld [vmem:[#allocation8 + $0xd8] sm:$0xff]  ;;  %v310_v16 = vld [vmem:[#allocation8 + $0xd0] sm:$0xff]  ;;  %v87_v18 = vld [vmem:[#allocation2 + $0x28] sm:$0xff] }
  0x30   :  { %260 = vmatpush.msra.mxu3 %v127_v52  ;;  %173 = vmatpush.msra.mxu0 %v94_v53  ;;  %v292_v19 = vld [vmem:[#allocation8 + $0x40] sm:$0xff]  ;;  %v309_v20 = vld [vmem:[#allocation8 + $0xc8] sm:$0xff]  ;;  %v291_v21 = vld [vmem:[#allocation8 + $0x38] sm:$0xff] }
  0x31   :  { %232 = vmatpush.msra.mxu2 %v93_v55  ;;  %202 = vmatpush.msra.mxu1 %v126_v58  ;;  %v308_v22 = vld [vmem:[#allocation8 + $0xc0] sm:$0xff]  ;;  %v290_v23 = vld [vmem:[#allocation8 + $0x30] sm:$0xff]  ;;  %v307_v24 = vld [vmem:[#allocation8 + $0xb8] sm:$0xff] }
  0x32   :  { %261 = vmatpush.msra.mxu3 %v125_v56  ;;  %174 = vmatpush.msra.mxu0 %v92_v57  ;;  %v289_v25 = vld [vmem:[#allocation8 + $0x28] sm:$0xff]  ;;  %v306_v26 = vld [vmem:[#allocation8 + $0xb0] sm:$0xff]  ;;  %v288_v29 = vld [vmem:[#allocation8 + $0x20] sm:$0xff] }
  0x33   :  { %233 = vmatpush.msra.mxu2 %v91_v59  ;;  %203 = vmatpush.msra.mxu1 %v124_v0  ;;  %v88_v27 = vld [vmem:[#allocation2 + $0x30] sm:$0x1]  ;;  %v89_v28 = vld [vmem:[#allocation2 + $0x38] sm:$0x1]  ;;  %v287_v31 = vld [vmem:[#allocation8 + $0x18] sm:$0xff] }
  0x34   :  { %262 = vmatpush.msra.mxu3 %v123_v60  ;;  %234 = vmatmul.f32.vlgmr.msra.gmra.mxu2 %v82_v61  ;;  %v305_v30 = vld [vmem:[#allocation8 + $0xa8] sm:$0xff]  ;;  %v304_v32 = vld [vmem:[#allocation8 + $0xa0] sm:$0xff]  ;;  %v286_v33 = vld [vmem:[#allocation8 + $0x10] sm:$0xff] }
  0x35   :  { %263 = vmatmul.f32.vlgmr.msra.gmra.mxu3 %v83_v62  ;;  %175 = vmatpush.msra.mxu0 %v90_v63  ;;  %v303_v34 = vld [vmem:[#allocation8 + $0x98] sm:$0xff]  ;;  %v285_v35 = vld [vmem:[#allocation8 + $0x8] sm:$0xff]  ;;  %v302_v36 = vld [vmem:[#allocation8 + $0x90] sm:$0xff] }
  0x36   :  { %176 = vmatmul.f32.vlgmr.msra.gmra.mxu0 %v82_v61  ;;  %403 = vmatpush.msrb.mxu2 %v299_v2  ;;  %v284_v37 = vld [vmem:[#allocation8] sm:$0xff]  ;;  %v301_v38 = vld [vmem:[#allocation8 + $0x88] sm:$0xff]  ;;  %v154_v40 = vld [vmem:[#allocation7] sm:$0x3] }
  0x37   :  { %204 = vmatpush.msra.mxu1 %v122_v1  ;;  %320 = vmatpush.msrb.mxu0 %v299_v2  ;;  %v300_v39 = vld [vmem:[#allocation8 + $0x80] sm:$0xff]  ;;  %v156_v41 = vperm.slane %v154_v40, 0  ;;  %v157_v44 = vperm.slane %v154_v40, 1 }
  0x38   :  { %205 = vmatmul.f32.vlgmr.msra.gmra.mxu1 %v83_v62  ;;  %404 = vmatpush.msrb.mxu2 %v298_v3 }
  0x39   :  { %321 = vmatpush.msrb.mxu0 %v298_v3  ;;  %349 = vmatpush.msrb.mxu1 %v315_v4 }
  0x3a   :  { %419 = vmatpush.msrb.mxu3 %v315_v4  ;;  %405 = vmatpush.msrb.mxu2 %v297_v5 }
  0x3b   :  { %322 = vmatpush.msrb.mxu0 %v297_v5  ;;  %350 = vmatpush.msrb.mxu1 %v314_v6 }
  0x3c   :  { %237 = vmatmul.f32.gmra.mxu2 %v84_v7  ;;  %420 = vmatpush.msrb.mxu3 %v314_v6 }
  0x3d   :  { %266 = vmatmul.f32.gmra.mxu3 %v85_v8  ;;  %323 = vmatpush.msrb.mxu0 %v296_v9 }
  0x3e   :  { %351 = vmatpush.msrb.mxu1 %v313_v10  ;;  %179 = vmatmul.f32.gmra.mxu0 %v84_v7 }
  0x3f   :  { %324 = vmatpush.msrb.mxu0 %v295_v11  ;;  %406 = vmatpush.msrb.mxu2 %v296_v9 }
  0x40   :  { %352 = vmatpush.msrb.mxu1 %v312_v12  ;;  %421 = vmatpush.msrb.mxu3 %v313_v10 }
  0x41   :  { %208 = vmatmul.f32.gmra.mxu1 %v85_v8  ;;  %325 = vmatpush.msrb.mxu0 %v294_v13 }
  0x42   :  { %353 = vmatpush.msrb.mxu1 %v311_v14  ;;  %407 = vmatpush.msrb.mxu2 %v295_v11 }
  0x43   :  { %326 = vmatpush.msrb.mxu0 %v293_v15  ;;  %422 = vmatpush.msrb.mxu3 %v312_v12 }
  0x44   :  { %354 = vmatpush.msrb.mxu1 %v310_v16  ;;  %240 = vmatmul.f32.gmra.mxu2 %v86_v17 }
  0x45   :  { %269 = vmatmul.f32.gmra.mxu3 %v87_v18  ;;  %327 = vmatpush.msrb.mxu0 %v292_v19 }
  0x46   :  { %355 = vmatpush.msrb.mxu1 %v309_v20  ;;  %182 = vmatmul.f32.gmra.mxu0 %v86_v17 }
  0x47   :  { %328 = vmatpush.msrb.mxu0 %v291_v21  ;;  %408 = vmatpush.msrb.mxu2 %v294_v13 }
  0x48   :  { %356 = vmatpush.msrb.mxu1 %v308_v22  ;;  %423 = vmatpush.msrb.mxu3 %v311_v14 }
  0x49   :  { %211 = vmatmul.f32.gmra.mxu1 %v87_v18  ;;  %329 = vmatpush.msrb.mxu0 %v290_v23 }
  0x4a   :  { %357 = vmatpush.msrb.mxu1 %v307_v24  ;;  %409 = vmatpush.msrb.mxu2 %v293_v15 }
  0x4b   :  { %330 = vmatpush.msrb.mxu0 %v289_v25  ;;  %424 = vmatpush.msrb.mxu3 %v310_v16 }
  0x4c   :  { %358 = vmatpush.msrb.mxu1 %v306_v26  ;;  %243 = vmatmul.f32.gmra.mxu2 %v88_v27 }
  0x4d   :  { %272 = vmatmul.f32.gmra.mxu3 %v89_v28  ;;  %331 = vmatpush.msrb.mxu0 %v288_v29 }
  0x4e   :  { %359 = vmatpush.msrb.mxu1 %v305_v30  ;;  %185 = vmatmul.f32.gmra.mxu0 %v88_v27 }
  0x4f   :  { %410 = vmatpush.msrb.mxu2 %v292_v19  ;;  %425 = vmatpush.msrb.mxu3 %v309_v20  ;;  %v444_v19 = vld [vmem:[%s640_s4] ss:$0 sm:$0xff] }
  0x50   :  { %332 = vmatpush.msrb.mxu0 %v287_v31  ;;  %360 = vmatpush.msrb.mxu1 %v304_v32 }
  0x51   :  { %214 = vmatmul.f32.gmra.mxu1 %v89_v28  ;;  %411 = vmatpush.msrb.mxu2 %v291_v21 }
  0x52   :  { %426 = vmatpush.msrb.mxu3 %v308_v22  ;;  %333 = vmatpush.msrb.mxu0 %v286_v33 }
  0x53   :  { %412 = vmatpush.msrb.mxu2 %v290_v23  ;;  %361 = vmatpush.msrb.mxu1 %v303_v34 }
  0x54   :  { %427 = vmatpush.msrb.mxu3 %v307_v24  ;;  %334 = vmatpush.msrb.mxu0 %v285_v35 }
  0x55   :  { %413 = vmatpush.msrb.mxu2 %v289_v25  ;;  %362 = vmatpush.msrb.mxu1 %v302_v36 }
  0x56   :  { %428 = vmatpush.msrb.mxu3 %v306_v26  ;;  %335 = vmatpush.msrb.mxu0 %v284_v37 }
  0x57   :  { %414 = vmatpush.msrb.mxu2 %v288_v29  ;;  %363 = vmatpush.msrb.mxu1 %v301_v38 }
  0x58   :  { %429 = vmatpush.msrb.mxu3 %v305_v30 }
  0x59   :  { %415 = vmatpush.msrb.mxu2 %v287_v31  ;;  %364 = vmatpush.msrb.mxu1 %v300_v39 }
  0x5a   :  { %430 = vmatpush.msrb.mxu3 %v304_v32 }
  0x5b   :  { %416 = vmatpush.msrb.mxu2 %v286_v33 }
  0x5c   :  { %431 = vmatpush.msrb.mxu3 %v303_v34 }
  0x5d   :  { %417 = vmatpush.msrb.mxu2 %v285_v35 }
  0x5e   :  { %432 = vmatpush.msrb.mxu3 %v302_v36 }
  0x5f   :  { %418 = vmatpush.msrb.mxu2 %v284_v37 }
  0x60   :  { %433 = vmatpush.msrb.mxu3 %v301_v38 }
  0x62   :  { %434 = vmatpush.msrb.mxu3 %v300_v39 }
  0xb3   :  { %v177_v42 = vpop.f32.mrf.mxu0 }
  0xb4   :  { %v178_v43 = vadd.f32 %v177_v42, %v156_v41 }
  0xb5   :  { %v206_v45 = vpop.f32.mrf.mxu1 }
  0xb6   :  { %v207_v46 = vadd.f32 %v206_v45, %v178_v43 }
  0xb7   :  { %v235_v47 = vpop.f32.mrf.mxu2 }
  0xb8   :  { %v264_v48 = vpop.f32.mrf.mxu3  ;;  %v276_v49 = vmax.f32 %v207_v46, 0.0  ;;  %v236_v50 = vadd.f32 %v235_v47, %v157_v44 }
  0xba   :  { %v265_v51 = vadd.f32 %v264_v48, %v236_v50  ;;  %336 = vmatmul.f32.vlgmr.msrb.gmra.mxu0 %v276_v49 }
  0xbb   :  { %v180_v52 = vpop.f32.mrf.mxu0 }
  0xbc   :  { %v277_v53 = vmax.f32 %v265_v51, 0.0  ;;  %v181_v54 = vadd.f32 %v180_v52, %v156_v41 }
  0xbe   :  { %v209_v55 = vpop.f32.mrf.mxu1  ;;  %365 = vmatmul.f32.vlgmr.msrb.gmra.mxu1 %v277_v53 }
  0xbf   :  { %v210_v56 = vadd.f32 %v209_v55, %v181_v54  ;;  %v238_v57 = vpop.f32.mrf.mxu2 }
  0xc0   :  { %v267_v58 = vpop.f32.mrf.mxu3  ;;  %v239_v60 = vadd.f32 %v238_v57, %v157_v44 }
  0xc1   :  { %v278_v59 = vmax.f32 %v210_v56, 0.0 }
  0xc2   :  { %v268_v61 = vadd.f32 %v267_v58, %v239_v60 }
  0xc3   :  { %339 = vmatmul.f32.gmra.mxu0 %v278_v59  ;;  %v183_v62 = vpop.f32.mrf.mxu0 }
  0xc4   :  { %v279_v63 = vmax.f32 %v268_v61, 0.0  ;;  %v184_v0 = vadd.f32 %v183_v62, %v156_v41 }
  0xc6   :  { %v212_v1 = vpop.f32.mrf.mxu1  ;;  %368 = vmatmul.f32.gmra.mxu1 %v279_v63 }
  0xc7   :  { %v213_v2 = vadd.f32 %v212_v1, %v184_v0  ;;  %v241_v3 = vpop.f32.mrf.mxu2 }
  0xc8   :  { %v270_v4 = vpop.f32.mrf.mxu3  ;;  %v242_v6 = vadd.f32 %v241_v3, %v157_v44 }
  0xc9   :  { %v280_v5 = vmax.f32 %v213_v2, 0.0 }
  0xca   :  { %v271_v7 = vadd.f32 %v270_v4, %v242_v6 }
  0xcb   :  { %342 = vmatmul.f32.vlgmr.msrb.gmra.mxu2 %v280_v5  ;;  %v186_v8 = vpop.f32.mrf.mxu0 }
  0xcc   :  { %v281_v9 = vmax.f32 %v271_v7, 0.0  ;;  %v187_v10 = vadd.f32 %v186_v8, %v156_v41 }
  0xce   :  { %v215_v11 = vpop.f32.mrf.mxu1  ;;  %371 = vmatmul.f32.vlgmr.msrb.gmra.mxu3 %v281_v9 }
  0xcf   :  { %v216_v12 = vadd.f32 %v215_v11, %v187_v10  ;;  %v244_v13 = vpop.f32.mrf.mxu2 }
  0xd0   :  { %v273_v14 = vpop.f32.mrf.mxu3  ;;  %v245_v16 = vadd.f32 %v244_v13, %v157_v44 }
  0xd1   :  { %v282_v15 = vmax.f32 %v216_v12, 0.0 }
  0xd2   :  { %v274_v17 = vadd.f32 %v273_v14, %v245_v16 }
  0xd3   :  { %345 = vmatmul.f32.gmra.mxu2 %v282_v15 }
  0xd4   :  { %v283_v18 = vmax.f32 %v274_v17, 0.0 }
  0xd6   :  { %374 = vmatmul.f32.gmra.mxu3 %v283_v18 }
 0x137   :  { %v337_v20 = vpop.f32.mrf.mxu0 }
 0x138   :  { %v338_v21 = vadd.f32 %v444_v19, %v337_v20 }
 0x13b   :  { %v366_v22 = vpop.f32.mrf.mxu1 }
 0x13c   :  { %v367_v23 = vadd.f32 %v366_v22, %v338_v21 }
 0x13e   :  { %378 = vst [vmem:[#allocation10] sm:$0xff] %v367_v23 }
 0x140   :  { %v340_v24 = vpop.f32.mrf.mxu0 }
 0x141   :  { %v341_v25 = vadd.f32 %v444_v19, %v340_v24 }
 0x143   :  { %v369_v26 = vpop.f32.mrf.mxu1 }
 0x144   :  { %v370_v27 = vadd.f32 %v369_v26, %v341_v25 }
 0x146   :  { %379 = vst [vmem:[#allocation10 + $0x8] sm:$0xff] %v370_v27 }
 0x14e   :  { %v343_v28 = vpop.f32.mrf.mxu2 }
 0x14f   :  { %v344_v29 = vadd.f32 %v444_v19, %v343_v28 }
 0x151   :  { %v372_v30 = vpop.f32.mrf.mxu3 }
 0x152   :  { %v373_v31 = vadd.f32 %v372_v30, %v344_v29 }
 0x154   :  { %380 = vst [vmem:[#allocation10 + $0x10] sm:$0xff] %v373_v31 }
 0x156   :  { %v346_v32 = vpop.f32.mrf.mxu2 }
 0x157   :  { %v347_v33 = vadd.f32 %v444_v19, %v346_v32 }
 0x159   :  { %v375_v34 = vpop.f32.mrf.mxu3 }
 0x15a   :  { %v376_v35 = vadd.f32 %v375_v34, %v347_v33 }
 0x15c   :  { %381 = vst [vmem:[#allocation10 + $0x18] sm:$0x1] %v376_v35 }
 0x15d   :  { %394 = dma.vmem_to_hbm [thread:$0]  %s387_s16, 512, %s389_s18, [#allocation4], %s579_s13, %s579_s13, %s580_s14  }
 0x15e   :  { %571 = dma.done.wait [#allocation4], 512  }
 0x15f   :  { %572 = vsyncadd [#allocation4], 4294966784 }
 0x160   :  { %399 = vsyncpa [#allocation3], 1 }
 0x161   :  { %400 = vsyncpa [#allocation6], 1 }
 0x162   :  { %401 = vsyncpa [#allocation9], 1 }
 0x163   :  { %402 = vsyncpa [#allocation4], 1 }

</bundles_post_ra>
